<compile_context>
chip_gen: v6e
topology: v6e:2x2x1
jax: 0.10.0
libtpu: 0.0.40
codegen_flags: <defaults>
</compile_context>

<pallas_src>
import math

import jax
import jax.numpy as jnp
from jax.experimental import pallas as pl
from jax.experimental.pallas import tpu as pltpu

_VMEM_LIMIT = 48 * 1024 * 1024  # <= v7x's 64 MiB per TensorCore; plenty on v5e/v6e.


def _pick_tile(dim, cap, align):
    """Largest tile <= cap dividing dim, preferring `align` multiples, then coarser
    fallbacks (128, 8); returns the full dimension if nothing divides."""
    if dim <= cap:
        return dim
    tried = []
    for a in (align, 128, 8):
        if a in tried or a > cap:
            continue
        tried.append(a)
        t = (cap // a) * a
        while t >= a:
            if dim % t == 0:
                return t
            t -= a
    return dim  # fallback: full dimension is always a legal block


# ---------------------------------------------------------------------------
# Tiled linear: out = x @ w + b   (bf16 operands, f32 accumulation)
# grid = (M//tm, N//tn, K//tk); the K axis is the ("arbitrary") reduction axis.
# ---------------------------------------------------------------------------
def _linear_kernel(x_ref, w_ref, b_ref, o_ref, acc_ref):
    k_idx = pl.program_id(2)

    @pl.when(k_idx == 0)
    def _():
        acc_ref[...] = jnp.zeros_like(acc_ref)

    acc_ref[...] += jnp.dot(x_ref[...], w_ref[...],
                            preferred_element_type=jnp.float32)

    @pl.when(k_idx == pl.num_programs(2) - 1)
    def _():
        o_ref[...] = (acc_ref[...] + b_ref[...].astype(jnp.float32)).astype(o_ref.dtype)


def _linear(x2d, w, b, out_dtype, *, tm_cap=512, tn_cap=1024, tk_cap=1024):
    M, K = x2d.shape
    Kw, N = w.shape
    assert K == Kw
    tm = _pick_tile(M, tm_cap, 128)
    tn = _pick_tile(N, tn_cap, 256)   # 256-aligned preferred (v6e/v7x MXU), 128 fallback
    tk = _pick_tile(K, tk_cap, 256)
    grid = (M // tm, N // tn, K // tk)
    return pl.pallas_call(
        _linear_kernel,
        out_shape=jax.ShapeDtypeStruct((M, N), out_dtype),
        grid=grid,
        in_specs=[
            pl.BlockSpec((tm, tk), lambda i, j, k: (i, k)),
            pl.BlockSpec((tk, tn), lambda i, j, k: (k, j)),
            pl.BlockSpec((1, tn), lambda i, j, k: (0, j)),
        ],
        out_specs=pl.BlockSpec((tm, tn), lambda i, j, k: (i, j)),
        scratch_shapes=[pltpu.VMEM((tm, tn), jnp.float32)],
        compiler_params=pltpu.CompilerParams(
            dimension_semantics=("parallel", "parallel", "arbitrary"),
            vmem_limit_bytes=_VMEM_LIMIT),
    )(x2d, w, b)


# ---------------------------------------------------------------------------
# Flash attention: online softmax over kv tiles, all heads batched per step.
# q/k/v are (B, H, T, hd); kernel sees (H, tq, hd) / (H, tk, hd) tiles.
# Output is written lane-dense straight into a (B, T, C) buffer.
# The softmax scale is pre-folded into the q projection weights.
# ---------------------------------------------------------------------------
def _flash_kernel(q_ref, k_ref, v_ref, o_ref, m_sc, l_sc, acc_sc):
    H, tq, hd = q_ref.shape
    tk = k_ref.shape[1]

    qi = pl.program_id(1)
    ki = pl.program_id(2)

    @pl.when(ki == 0)
    def _init():
        m_sc[...] = jnp.full_like(m_sc, -jnp.inf)
        l_sc[...] = jnp.zeros_like(l_sc)
        acc_sc[...] = jnp.zeros_like(acc_sc)

    def _attend(apply_mask):
        q = q_ref[...]
        k = k_ref[...]
        v = v_ref[...]

        # Scores for all heads at once; contraction over last dims -> no k.T repack.
        s = jnp.einsum("hqd,hkd->hqk", q, k, preferred_element_type=jnp.float32)

        if apply_mask:  # only the diagonal tile needs the causal mask (tq == tk)
            row = qi * tq + jax.lax.broadcasted_iota(jnp.int32, (tq, tk), 0)
            col = ki * tk + jax.lax.broadcasted_iota(jnp.int32, (tq, tk), 1)
            s = jnp.where((row >= col)[None, :, :], s, jnp.float32(-1e30))

        # Online (flash) softmax update, all math in f32.
        m_prev = m_sc[...]
        m_new = jnp.maximum(m_prev, jnp.max(s, axis=-1, keepdims=True))
        alpha = jnp.exp(m_prev - m_new)
        p = jnp.exp(s - m_new)
        l_sc[...] = alpha * l_sc[...] + jnp.sum(p, axis=-1, keepdims=True)
        acc_sc[...] = alpha * acc_sc[...] + jnp.einsum(
            "hqk,hkd->hqd", p.astype(v.dtype), v, preferred_element_type=jnp.float32)
        m_sc[...] = m_new

    # Interior tiles (strictly below the diagonal): no mask work at all.
    @pl.when(ki < qi)
    def _interior():
        _attend(apply_mask=False)

    # Diagonal tile: apply the causal mask.
    @pl.when(ki == qi)
    def _diagonal():
        _attend(apply_mask=True)

    # ki > qi: fully masked -> no compute (and the clamped index_map issued no DMA).

    @pl.when(ki == pl.num_programs(2) - 1)
    def _finalize():
        inv_l = pl.reciprocal(l_sc[...], approx=True)   # (H, tq, 1), EUP slot
        # Assemble heads into the lane-dense (tq, C) output block; static unroll,
        # finalize-only (H small), all 2-D ops -> robust lowering.
        for h in range(H):
            o_ref[:, h * hd:(h + 1) * hd] = (acc_sc[h] * inv_l[h]).astype(o_ref.dtype)


def _flash_attention(q, k, v, *, tile_cap=256):
    B, H, T, hd = q.shape
    C = H * hd
    tq = _pick_tile(T, tile_cap, 128)
    tk = tq  # required for the causal tile logic + DMA clamp below
    grid = (B, T // tq, T // tk)
    return pl.pallas_call(
        _flash_kernel,
        out_shape=jax.ShapeDtypeStruct((B, T, C), q.dtype),
        grid=grid,
        in_specs=[
            pl.BlockSpec((None, H, tq, hd), lambda b, qi, ki: (b, 0, qi, 0)),
            # Clamp the kv block index: tiles above the diagonal repeat the previous
            # block index, so no DMA is issued for them (compute is skipped anyway).
            pl.BlockSpec((None, H, tk, hd),
                         lambda b, qi, ki: (b, 0, jnp.minimum(ki, qi), 0)),
            pl.BlockSpec((None, H, tk, hd),
                         lambda b, qi, ki: (b, 0, jnp.minimum(ki, qi), 0)),
        ],
        out_specs=pl.BlockSpec((None, tq, C), lambda b, qi, ki: (b, qi, 0)),
        scratch_shapes=[
            pltpu.VMEM((H, tq, 1), jnp.float32),    # running max m
            pltpu.VMEM((H, tq, 1), jnp.float32),    # running denom l
            pltpu.VMEM((H, tq, hd), jnp.float32),   # output accumulator
        ],
        compiler_params=pltpu.CompilerParams(
            dimension_semantics=("parallel", "parallel", "arbitrary"),
            vmem_limit_bytes=_VMEM_LIMIT),
    )(q, k, v)


# ---------------------------------------------------------------------------
# Full module forward (eval mode): fused QKV -> flash attention -> output proj.
# params: wqkv (C, 3C) bf16 (q columns pre-scaled by 1/sqrt(hd)), bqkv (1, 3C) f32,
#         wp (C, C) bf16, bp (1, C) f32.
# ---------------------------------------------------------------------------
def causal_self_attention(x, params, n_head):
    B, T, C = x.shape
    assert C % n_head == 0
    hd = C // n_head

    x2d = x.reshape(B * T, C).astype(jnp.bfloat16)

    # 1) fused QKV projection (single wide matmul keeps MXU output lanes full)
    qkv = _linear(x2d, params["wqkv"], params["bqkv"], jnp.bfloat16)      # (B*T, 3C)

    # 2) head-major layout for attention (single XLA transpose; see TODO above)
    qkv = qkv.reshape(B, T, 3, n_head, hd).transpose(2, 0, 3, 1, 4)       # (3, B, H, T, hd)
    q, k, v = qkv[0], qkv[1], qkv[2]
    y = _flash_attention(q, k, v)                                         # (B, T, C) bf16

    # 3) output projection straight from the lane-dense attention output
    out = _linear(y.reshape(B * T, C), params["wp"], params["bp"], x.dtype)  # (B*T, C)
    return out.reshape(B, T, C)


def _reference(x, params, n_head):
    """Plain-JAX f32 reference mirroring the PyTorch forward (flash path, eval mode)."""
    B, T, C = x.shape
    hd = C // n_head
    q = x @ params["wq"] + params["bq"]
    k = x @ params["wk"] + params["bk"]
    v = x @ params["wv"] + params["bv"]
    q = q.reshape(B, T, n_head, hd).transpose(0, 2, 1, 3)
    k = k.reshape(B, T, n_head, hd).transpose(0, 2, 1, 3)
    v = v.reshape(B, T, n_head, hd).transpose(0, 2, 1, 3)
    att = jnp.einsum("bhqd,bhkd->bhqk", q, k) / math.sqrt(hd)
    mask = jnp.tril(jnp.ones((T, T), dtype=bool))
    att = jnp.where(mask[None, None], att, -jnp.inf)
    att = jax.nn.softmax(att, axis=-1)
    y = jnp.einsum("bhqk,bhkd->bhqd", att, v)
    y = y.transpose(0, 2, 1, 3).reshape(B, T, C)
    return y @ params["wp"] + params["bp"]


if __name__ == "__main__":
    # Small shapes consistent with the module's forward: (B, T, C), n_head divides C.
    B, T, C, n_head = 2, 8, 32, 4
    hd = C // n_head
    scale = 1.0 / math.sqrt(hd)

    key = jax.random.PRNGKey(0)
    keys = jax.random.split(key, 9)
    w_scale = 1.0 / math.sqrt(C)

    # f32 reference parameters (weights pre-transposed to (in, out); biases (1, C)).
    ref_params = {
        "wq": jax.random.normal(keys[0], (C, C), jnp.float32) * w_scale,
        "bq": jax.random.normal(keys[1], (1, C), jnp.float32) * 0.02,
        "wk": jax.random.normal(keys[2], (C, C), jnp.float32) * w_scale,
        "bk": jax.random.normal(keys[3], (1, C), jnp.float32) * 0.02,
        "wv": jax.random.normal(keys[4], (C, C), jnp.float32) * w_scale,
        "bv": jax.random.normal(keys[5], (1, C), jnp.float32) * 0.02,
        "wp": jax.random.normal(keys[6], (C, C), jnp.float32) * w_scale,
        "bp": jax.random.normal(keys[7], (1, C), jnp.float32) * 0.02,
    }
    x = jax.random.normal(keys[8], (B, T, C), jnp.float32)

    # Kernel parameters: fused QKV weight with the softmax scale folded into the
    # q columns (in f32, before the bf16 cast).  Biases stay f32.
    kernel_params = {
        "wqkv": jnp.concatenate(
            [ref_params["wq"] * scale, ref_params["wk"], ref_params["wv"]], axis=1
        ).astype(jnp.bfloat16),                                               # (C, 3C)
        "bqkv": jnp.concatenate(
            [ref_params["bq"] * scale, ref_params["bk"], ref_params["bv"]], axis=1),  # (1, 3C)
        "wp": ref_params["wp"].astype(jnp.bfloat16),
        "bp": ref_params["bp"],
    }

    y = causal_self_attention(x, kernel_params, n_head)
    y = jax.block_until_ready(y)

    y_ref = _reference(x, ref_params, n_head)
    assert y.shape == (B, T, C)
    max_err = float(jnp.max(jnp.abs(y - y_ref)))
    assert jnp.allclose(y, y_ref, atol=5e-2, rtol=5e-2), f"mismatch vs reference, max_err={max_err}"

    print("KERNEL_OK")
</pallas_src>

<mosaic_0001>
module attributes {stable_mosaic.version = 11 : i64} {
  func.func @_linear_kernel(%arg0: i32, %arg1: i32, %arg2: i32, %arg3: memref<16x32xbf16, #tpu.memory_space<vmem>>, %arg4: memref<32x96xbf16, #tpu.memory_space<vmem>>, %arg5: memref<1x96xf32, #tpu.memory_space<vmem>>, %arg6: memref<16x96xbf16, #tpu.memory_space<vmem>>, %arg7: memref<16x96xf32, #tpu.memory_space<vmem>>) attributes {dimension_semantics = [#tpu.dimension_semantics<parallel>, #tpu.dimension_semantics<parallel>, #tpu.dimension_semantics<arbitrary>], iteration_bounds = array<i64: 1, 1, 1>, scalar_prefetch = 0 : i64, scratch_operands = 1 : i64, tpu.core_type = #tpu.core_type<tc>, window_params = [{transform_indices = @transform_0, window_bounds = array<i64: 16, 32>}, {transform_indices = @transform_1, window_bounds = array<i64: 32, 96>}, {transform_indices = @transform_2, window_bounds = array<i64: 1, 96>}, {transform_indices = @transform_3, window_bounds = array<i64: 16, 96>}]} {
    %c0_i32 = arith.constant 0 : i32
    %0 = arith.cmpi eq, %arg2, %c0_i32 : i32
    %1 = arith.extui %0 : i1 to i32
    %c0_i32_0 = arith.constant 0 : i32
    %2 = arith.cmpi ne, %1, %c0_i32_0 : i32
    scf.if %2 {
      %cst_10 = arith.constant 0.000000e+00 : f32
      %12 = vector.broadcast %cst_10 : f32 to vector<16x96xf32>
      %c0_11 = arith.constant 0 : index
      %c0_12 = arith.constant 0 : index
      %13 = vector.load %arg7[%c0_11, %c0_12] : memref<16x96xf32, #tpu.memory_space<vmem>>, vector<16x96xf32>
      tpu.vector_store %arg7[%c0_11, %c0_12], %12 {strides = array<i32>} : memref<16x96xf32, #tpu.memory_space<vmem>>, vector<16x96xf32>,
    } else {
    }
    %c0 = arith.constant 0 : index
    %c0_1 = arith.constant 0 : index
    %3 = vector.load %arg7[%c0, %c0_1] : memref<16x96xf32, #tpu.memory_space<vmem>>, vector<16x96xf32>
    %c0_2 = arith.constant 0 : index
    %c0_3 = arith.constant 0 : index
    %4 = vector.load %arg3[%c0_2, %c0_3] : memref<16x32xbf16, #tpu.memory_space<vmem>>, vector<16x32xbf16>
    %c0_4 = arith.constant 0 : index
    %c0_5 = arith.constant 0 : index
    %5 = vector.load %arg4[%c0_4, %c0_5] : memref<32x96xbf16, #tpu.memory_space<vmem>>, vector<32x96xbf16>
    %cst = arith.constant dense<0.000000e+00> : vector<16x96xf32>
    %6 = tpu.matmul %4, %5, %cst {dimension_numbers = #tpu.dot_dimension_numbers<[1], [0], [0], [1], [0, 0, 1, 1], [], []>} : vector<16x32xbf16>, vector<32x96xbf16>, vector<16x96xf32> -> vector<16x96xf32>
    %7 = arith.addf %3, %6 : vector<16x96xf32>
    %c0_6 = arith.constant 0 : index
    %c0_7 = arith.constant 0 : index
    %8 = vector.load %arg7[%c0_6, %c0_7] : memref<16x96xf32, #tpu.memory_space<vmem>>, vector<16x96xf32>
    tpu.vector_store %arg7[%c0_6, %c0_7], %7 {strides = array<i32>} : memref<16x96xf32, #tpu.memory_space<vmem>>, vector<16x96xf32>,
    %c0_i32_8 = arith.constant 0 : i32
    %9 = arith.cmpi eq, %arg2, %c0_i32_8 : i32
    %10 = arith.extui %9 : i1 to i32
    %c0_i32_9 = arith.constant 0 : i32
    %11 = arith.cmpi ne, %10, %c0_i32_9 : i32
    scf.if %11 {
      %c0_10 = arith.constant 0 : index
      %c0_11 = arith.constant 0 : index
      %12 = vector.load %arg7[%c0_10, %c0_11] : memref<16x96xf32, #tpu.memory_space<vmem>>, vector<16x96xf32>
      %c0_12 = arith.constant 0 : index
      %c0_13 = arith.constant 0 : index
      %13 = vector.load %arg5[%c0_12, %c0_13] : memref<1x96xf32, #tpu.memory_space<vmem>>, vector<1x96xf32>
      %14 = vector.broadcast %13 : vector<1x96xf32> to vector<16x96xf32>
      %15 = arith.addf %12, %14 : vector<16x96xf32>
      %16 = arith.truncf %15 : vector<16x96xf32> to vector<16x96xbf16>
      %c0_14 = arith.constant 0 : index
      %c0_15 = arith.constant 0 : index
      %17 = vector.load %arg6[%c0_14, %c0_15] : memref<16x96xbf16, #tpu.memory_space<vmem>>, vector<16x96xbf16>
      tpu.vector_store %arg6[%c0_14, %c0_15], %16 {strides = array<i32>} : memref<16x96xbf16, #tpu.memory_space<vmem>>, vector<16x96xbf16>,
    } else {
    }
    return
  }
  func.func @transform_0(%arg0: i32, %arg1: i32, %arg2: i32) -> (i32, i32) {
    %c0_i32 = arith.constant 0 : i32
    return %arg0, %arg2 : i32, i32
  }
  func.func @transform_1(%arg0: i32, %arg1: i32, %arg2: i32) -> (i32, i32) {
    %c0_i32 = arith.constant 0 : i32
    return %arg2, %arg1 : i32, i32
  }
  func.func @transform_2(%arg0: i32, %arg1: i32, %arg2: i32) -> (i32, i32) {
    %c0_i32 = arith.constant 0 : i32
    %c0_i32_0 = arith.constant 0 : i32
    return %c0_i32, %arg1 : i32, i32
  }
  func.func @transform_3(%arg0: i32, %arg1: i32, %arg2: i32) -> (i32, i32) {
    %c0_i32 = arith.constant 0 : i32
    return %arg0, %arg1 : i32, i32
  }
}

</mosaic_0001>

<bundles_post_ra>
// kernel: tpu_custom_call.1
= control target key start
LH: loop header
LB: loop body
LE: loop exit
PB: predicated region body
PF: predicated region fallthrough
CT: control target
= control target key end

     0   :  { %8 = vsyncpa [#allocation4], 0  ;;  %s317_s0 = inlined_call_operand.hbm [shape: bf16[16,32], index: 0, kind: input, shape index: {}]   ;;  %s318_s1 = inlined_call_operand.hbm [shape: bf16[32,96], index: 1, kind: input, shape index: {}]   ;;  %s319_s2 = inlined_call_operand.vmem [shape: f32[1,96], index: 2, kind: input, shape index: {}]   ;;  %s320_s3 = inlined_call_operand.hbm [shape: bf16[16,96], index: 3, kind: output, shape index: {}]  }
   0x1   :  { %9 = vsyncpa [#allocation7], 0 }
   0x2   :  { %10 = vsyncpa [#allocation5], 0  ;;  %s265_s12 = smov [#allocation3]  }
   0x3   :  { %s16_s13 = sshll.u32 %s265_s12, 4  ;;  %s17_s13 = int_to_ptr.vmem [resolvable:$true] %s16_s13 }
   0x4   :  { %s207_s14 = scalar_lea.vmem %s17_s13, 128  ;;  %p212_p1 = scmp.lt.s32.totalorder %s17_s13, %s17_s13 }
   0x5   :  { %p208_p0 = scmp.ne.s32.totalorder %s17_s13, %s207_s14  ;;  %p213_p2 = scmp.lt.s32.totalorder %s207_s14, %s207_s14 }
   0x7   :  { %p214_p3 = por %p213_p2, %p212_p1 }
   0x9   :  { %p215_p4 = pnand %p214_p3, %p208_p0 }
   0xb   :  { %218 = shalt.err (!%p215_p4)
}
   0xc   :  { %s266_s15 = smov 64   ;;  %s267_s16 = smov 4  }
   0xd   :  { %22 = dma.hbm_to_vmem [thread:$0]  %s317_s0, 128, %s17_s13, [#allocation4], %s266_s15, %s266_s15, %s267_s16  }
   0xe   :  { %s268_s19 = smov [#allocation6]  }
   0xf   :  { %s28_s20 = sshll.u32 %s268_s19, 4  ;;  %s29_s20 = int_to_ptr.vmem [resolvable:$true] %s28_s20 }
  0x10   :  { %s227_s21 = scalar_lea.vmem %s29_s20, 256  ;;  %p232_p6 = scmp.lt.s32.totalorder %s29_s20, %s29_s20 }
  0x11   :  { %p228_p5 = scmp.ne.s32.totalorder %s29_s20, %s227_s21  ;;  %p233_p7 = scmp.lt.s32.totalorder %s227_s21, %s227_s21 }
  0x13   :  { %p234_p8 = por %p233_p7, %p232_p6 }
  0x15   :  { %p235_p9 = pnand %p234_p8, %p228_p5 }
  0x17   :  { %238 = shalt.err (!%p235_p9)
}
  0x18   :  { %34 = dma.hbm_to_vmem [thread:$0]  %s318_s1, 256, %s29_s20, [#allocation7], %s266_s15, %s266_s15, %s267_s16  }
  0x19   :  { %259 = dma.done.wait [#allocation4], 128  }
  0x1a   :  { %260 = vsyncadd [#allocation4], 4294967168 }
  0x1b   :  { %261 = dma.done.wait [#allocation7], 256  }
  0x1c   :  { %262 = vsyncadd [#allocation7], 4294967040  ;;  %vm48_vm0 = vcmask 785408   ;;  %v269_v0 = vmov 0.0   ;;  %vm270_vm1 = vmmov 0   ;;  %v196_v1 = vld [vmem:[#allocation6 + $0x8] sm:$0xff]  }
  0x1d   :  { %49 = vst.msk [vmem:[#allocation2] sm:$0xff] %vm48_vm0, %v269_v0  ;;  %50 = vst.msk [vmem:[#allocation2 + $0x8] sm:$0xff] %vm48_vm0, %v269_v0  ;;  %181 = vmatprep.subr.bf16.mxu0 %v269_v0  ;;  %185 = vmatprep.mubr.msk.bf16.mxu0 %vm270_vm1, %v269_v0  ;;  %v197_v2 = vld [vmem:[#allocation6] sm:$0xff]   ;;  %v198_v3 = vld [vmem:[#allocation3] sm:$0xff]   ;;  %vm76_vm2 = vcmask 261120   ;;  %vm148_vm3 = vcmask 781312  }
  0x1e   :  { %182 = vmatpush3.bf16.msra.mxu0 %v196_v1  ;;  %v173_v12 = vld [vmem:[%s319_s2] ss:$0 sm:$0xff]  ;;  %s271_s24 = smov [#allocation8]  }
  0x1f   :  { %183 = vmatprep.subr.bf16.mxu0 %v269_v0  ;;  %s156_s25 = sshll.u32 %s271_s24, 4  ;;  %s157_s25 = int_to_ptr.vmem [resolvable:$true] %s156_s25 }
  0x20   :  { %s239_s26 = scalar_lea.vmem %s157_s25, 128  ;;  %p244_p11 = scmp.lt.s32.totalorder %s157_s25, %s157_s25 }
  0x21   :  { %p240_p10 = scmp.ne.s32.totalorder %s157_s25, %s239_s26  ;;  %p245_p12 = scmp.lt.s32.totalorder %s239_s26, %s239_s26 }
  0x22   :  { %184 = vmatpush3.bf16.msra.mxu0 %v197_v2 }
  0x23   :  { %p246_p13 = por %p245_p12, %p244_p11 }
  0x24   :  { %v51_v4 = vld [vmem:[#allocation2] sm:$0xff]  ;;  %v52_v8 = vld [vmem:[#allocation2 + $0x8] sm:$0xff] }
  0x25   :  { %186 = vmatmul.mubr.msk.bf16.vlgmr.msra.gmra.mxu0 %vm76_vm2, %v198_v3  ;;  %p247_p0 = pnand %p246_p13, %p240_p10 }
  0xe5   :  { %v114_v5 = vpop.f32.mrf.mxu0 }
  0xe6   :  { %v121_v6 = vadd.f32 %v114_v5, %v51_v4 }
  0xe7   :  { %v187_v7 = vpop.f32.mrf.mxu0 }
  0xe8   :  { %124 = vst.msk [vmem:[#allocation2] sm:$0xff] %vm48_vm0, %v121_v6 }
  0xe9   :  { %v117_v9 = vpop.f32.mrf.mxu0 }
  0xea   :  { %v122_v10 = vadd.f32 %v117_v9, %v52_v8 }
  0xeb   :  { %v188_v11 = vpop.f32.mrf.mxu0 }
  0xec   :  { %125 = vst.msk [vmem:[#allocation2 + $0x8] sm:$0xff] %vm48_vm0, %v122_v10 }
  0xef   :  { %v129_v13 = vld [vmem:[#allocation2] sm:$0xff] }
  0xf0   :  { %v138_v14 = vadd.f32 %v173_v12, %v129_v13 }
  0xf2   :  { %v176_v15 = vpack.c.bf16 %v138_v14, %v138_v14 }
  0xf3   :  { %v130_v16 = vld [vmem:[#allocation2 + $0x8] sm:$0xff] }
  0xf4   :  { %v139_v17 = vadd.f32 %v173_v12, %v130_v16  ;;  %149 = vst.msk [vmem:[#allocation8] sm:$0xf] %vm148_vm3, %v176_v15 }
  0xf6   :  { %v177_v18 = vpack.c.bf16 %v139_v17, %v139_v17 }
  0xf8   :  { %150 = vst.msk [vmem:[#allocation8 + $0x4] sm:$0xf] %vm148_vm3, %v177_v18 }
  0xf9   :  { %250 = shalt.err (!%p247_p0)
}
  0xfa   :  { %162 = dma.vmem_to_hbm [thread:$0]  %s157_s25, 128, %s320_s3, [#allocation5], %s266_s15, %s266_s15, %s267_s16  }
  0xfb   :  { %263 = dma.done.wait [#allocation5], 128  }
  0xfc   :  { %264 = vsyncadd [#allocation5], 4294967168 }
  0xfd   :  { %166 = vsyncpa [#allocation4], 1 }
  0xfe   :  { %167 = vsyncpa [#allocation7], 1 }
  0xff   :  { %168 = vsyncpa [#allocation5], 1 }

</bundles_post_ra>
